<compile_context>
chip_gen: v6e
topology: v6e:2x2x1
jax: 0.10.0
libtpu: 0.0.40
codegen_flags: <defaults>
</compile_context>

<pallas_src>
import functools

import numpy as np
import jax
import jax.numpy as jnp
from jax.experimental import pallas as pl
from jax.experimental.pallas import tpu as pltpu


_MAX_TILE_N = 256  # row tile; 2 * TILE_N * M * 4B stays tiny vs 32 MiB scoped VMEM


def _row_tiling(n):
    """Pick a row tile size and the padded row count."""
    if n <= _MAX_TILE_N:
        return n, n
    tile_n = _MAX_TILE_N
    n_padded = ((n + tile_n - 1) // tile_n) * tile_n
    return tile_n, n_padded


def _build_combine_matrix(n, m, n_padded):
    """Host-side (hoisted) selection/scale matrix W of shape (n_padded, 2n).

    W[j, i] = #{k in {3i, 3i+1, 3i+2} : k % n == j} / (3*m)   for j < n
            = 0                                               for j >= n (pad rows)
    so that  out_row = rowsums^T @ W  gives the per-view-row means.
    """
    i = np.arange(2 * n)
    ks = (3 * i[:, None] + np.arange(3)[None, :]) % n                 # (2n, 3)
    counts = (ks[:, :, None] == np.arange(n)[None, None, :]).sum(1)   # (2n, n)
    w = counts.astype(np.float32).T / np.float32(3 * m)               # (n, 2n)
    if n_padded > n:
        w = np.pad(w, ((0, n_padded - n), (0, 0)))
    return jnp.asarray(w)


def _rowsum_kernel(x_ref, o_ref):
    # (TILE_N, M) -> (TILE_N, 1) row sums. Lane reduce only; no cat chain.
    o_ref[...] = jnp.sum(x_ref[...], axis=1, keepdims=True)


def _combine_kernel(rs_ref, w_ref, o_ref):
    # rs: (Np, 1), w: (Np, 2N)  ->  lane-dense (1, 2N) result.
    # Broadcast-multiply + sublane reduce (pure VPU/XLU; no quadratic in-kernel
    # matrix construction, no 1-wide MXU matmul).
    t = jnp.sum(rs_ref[...] * w_ref[...], axis=0, keepdims=True)      # (1, 2N)
    o_ref[...] = t * t                                                # .pow(2)


@jax.jit
def model_forward(x):
    """Pallas implementation of Model.forward. x: (N, M) f32 -> (2N,) f32."""
    x = x.astype(jnp.float32)
    n, m = x.shape
    tile_n, n_padded = _row_tiling(n)
    if n_padded > n:
        # Zero-pad rows so every tile is fully in-bounds; padded rows get
        # row-sum 0 and are multiplied by zero rows of W.
        x = jnp.pad(x, ((0, n_padded - n), (0, 0)))
    num_tiles = n_padded // tile_n

    # Stage 1: tiled, pipelined row-sum reduction (the only O(N*M) work).
    rowsums = pl.pallas_call(
        _rowsum_kernel,
        out_shape=jax.ShapeDtypeStruct((n_padded, 1), jnp.float32),
        grid=(num_tiles,),
        in_specs=[pl.BlockSpec((tile_n, m), lambda i: (i, 0))],
        out_specs=pl.BlockSpec((tile_n, 1), lambda i: (i, 0)),
        compiler_params=pltpu.CompilerParams(
            dimension_semantics=("parallel",),
            vmem_limit_bytes=32 * 1024 * 1024,
        ),
    )(x)

    # Hoisted (per-shape, host-built) selection/scale matrix.
    w = _build_combine_matrix(n, m, n_padded)

    # Stage 2: tiny combine; lane-dense (1, 2N) output.
    # TODO(synk): for very large N, replace the (Np, 2N) one-hot matrix with a
    # roll-based group-of-3 sum + strided gather to avoid O(N^2) memory.
    out = pl.pallas_call(
        _combine_kernel,
        out_shape=jax.ShapeDtypeStruct((1, 2 * n), jnp.float32),
        grid=(1,),
        in_specs=[
            pl.BlockSpec((n_padded, 1), lambda i: (0, 0)),
            pl.BlockSpec((n_padded, 2 * n), lambda i: (0, 0)),
        ],
        out_specs=pl.BlockSpec((1, 2 * n), lambda i: (0, 0)),
        compiler_params=pltpu.CompilerParams(
            dimension_semantics=("arbitrary",),
            vmem_limit_bytes=32 * 1024 * 1024,
        ),
    )(rowsums, w)

    return out[0, :]


def model_reference(x):
    """Pure-JAX reference mirroring the PyTorch module exactly."""
    a = jnp.concatenate([x, x], axis=0)
    b = jnp.concatenate([a, a, a], axis=1)
    c = jnp.concatenate([b, b, b], axis=0)
    d = jnp.concatenate([c, c], axis=1).reshape(b.shape[0], -1)
    return jnp.mean(d, axis=1) ** 2


if __name__ == "__main__":
    key = jax.random.PRNGKey(0)

    # Module's example input shape: torch.randn(1, 2)
    x_small = jax.random.normal(key, (1, 2), dtype=jnp.float32)
    y = jax.block_until_ready(model_forward(x_small))
    y_ref = model_reference(x_small)
    assert y.shape == (2,), y.shape
    assert jnp.allclose(y, y_ref, rtol=1e-5, atol=1e-6), (y, y_ref)

    # Exercise the multi-tile (padded, pipelined) path as well.
    x_big = jax.random.normal(jax.random.PRNGKey(0), (300, 40), dtype=jnp.float32)
    y2 = jax.block_until_ready(model_forward(x_big))
    y2_ref = model_reference(x_big)
    assert y2.shape == (600,), y2.shape
    assert jnp.allclose(y2, y2_ref, rtol=1e-4, atol=1e-6), float(
        jnp.max(jnp.abs(y2 - y2_ref))
    )

    print("KERNEL_OK")
</pallas_src>

<mosaic_0001>
module attributes {stable_mosaic.version = 11 : i64} {
  func.func @_combine_kernel(%arg0: i32, %arg1: memref<1x1xf32, #tpu.memory_space<vmem>>, %arg2: memref<1x2xf32, #tpu.memory_space<vmem>>, %arg3: memref<1x2xf32, #tpu.memory_space<vmem>>) attributes {dimension_semantics = [#tpu.dimension_semantics<arbitrary>], iteration_bounds = array<i64: 1>, scalar_prefetch = 0 : i64, scratch_operands = 0 : i64, tpu.core_type = #tpu.core_type<tc>, window_params = [{pipeline_mode = #tpu.pipeline_mode<synchronous>, transform_indices = @transform_0, window_bounds = array<i64: 1, 1>}, {pipeline_mode = #tpu.pipeline_mode<synchronous>, transform_indices = @transform_1, window_bounds = array<i64: 1, 2>}, {pipeline_mode = #tpu.pipeline_mode<synchronous>, transform_indices = @transform_2, window_bounds = array<i64: 1, 2>}]} {
    %c0 = arith.constant 0 : index
    %c0_0 = arith.constant 0 : index
    %0 = vector.load %arg1[%c0, %c0_0] : memref<1x1xf32, #tpu.memory_space<vmem>>, vector<1x1xf32>
    %c0_1 = arith.constant 0 : index
    %c0_2 = arith.constant 0 : index
    %1 = vector.load %arg2[%c0_1, %c0_2] : memref<1x2xf32, #tpu.memory_space<vmem>>, vector<1x2xf32>
    %2 = vector.broadcast %0 : vector<1x1xf32> to vector<1x2xf32>
    %3 = arith.mulf %2, %1 : vector<1x2xf32>
    %cst = arith.constant dense<0.000000e+00> : vector<2xf32>
    %4 = vector.multi_reduction <add>, %3, %cst [0] : vector<1x2xf32> to vector<2xf32>
    %5 = vector.shape_cast %4 : vector<2xf32> to vector<1x2xf32>
    %6 = arith.mulf %5, %5 : vector<1x2xf32>
    %c0_3 = arith.constant 0 : index
    %c0_4 = arith.constant 0 : index
    %7 = vector.load %arg3[%c0_3, %c0_4] : memref<1x2xf32, #tpu.memory_space<vmem>>, vector<1x2xf32>
    tpu.vector_store %arg3[%c0_3, %c0_4], %6 {strides = array<i32>} : memref<1x2xf32, #tpu.memory_space<vmem>>, vector<1x2xf32>,
    return
  }
  func.func @transform_0(%arg0: i32) -> (i32, i32) {
    %c0_i32 = arith.constant 0 : i32
    %c0_i32_0 = arith.constant 0 : i32
    %c0_i32_1 = arith.constant 0 : i32
    return %c0_i32, %c0_i32_0 : i32, i32
  }
  func.func @transform_1(%arg0: i32) -> (i32, i32) {
    %c0_i32 = arith.constant 0 : i32
    %c0_i32_0 = arith.constant 0 : i32
    %c0_i32_1 = arith.constant 0 : i32
    return %c0_i32, %c0_i32_0 : i32, i32
  }
  func.func @transform_2(%arg0: i32) -> (i32, i32) {
    %c0_i32 = arith.constant 0 : i32
    %c0_i32_0 = arith.constant 0 : i32
    %c0_i32_1 = arith.constant 0 : i32
    return %c0_i32, %c0_i32_0 : i32, i32
  }
}

module attributes {stable_mosaic.version = 11 : i64} {
  func.func @_rowsum_kernel(%arg0: i32, %arg1: memref<1x2xf32, #tpu.memory_space<vmem>>, %arg2: memref<1x1xf32, #tpu.memory_space<vmem>>) attributes {dimension_semantics = [#tpu.dimension_semantics<parallel>], iteration_bounds = array<i64: 1>, scalar_prefetch = 0 : i64, scratch_operands = 0 : i64, tpu.core_type = #tpu.core_type<tc>, window_params = [{transform_indices = @transform_0, window_bounds = array<i64: 1, 2>}, {transform_indices = @transform_1, window_bounds = array<i64: 1, 1>}]} {
    %c0 = arith.constant 0 : index
    %c0_0 = arith.constant 0 : index
    %0 = vector.load %arg1[%c0, %c0_0] : memref<1x2xf32, #tpu.memory_space<vmem>>, vector<1x2xf32>
    %cst = arith.constant dense<0.000000e+00> : vector<1xf32>
    %1 = vector.multi_reduction <add>, %0, %cst [1] : vector<1x2xf32> to vector<1xf32>
    %2 = vector.shape_cast %1 : vector<1xf32> to vector<1x1xf32>
    %c0_1 = arith.constant 0 : index
    %c0_2 = arith.constant 0 : index
    %3 = vector.load %arg2[%c0_1, %c0_2] : memref<1x1xf32, #tpu.memory_space<vmem>>, vector<1x1xf32>
    tpu.vector_store %arg2[%c0_1, %c0_2], %2 {strides = array<i32>} : memref<1x1xf32, #tpu.memory_space<vmem>>, vector<1x1xf32>,
    return
  }
  func.func @transform_0(%arg0: i32) -> (i32, i32) {
    %c0_i32 = arith.constant 0 : i32
    %c0_i32_0 = arith.constant 0 : i32
    return %arg0, %c0_i32 : i32, i32
  }
  func.func @transform_1(%arg0: i32) -> (i32, i32) {
    %c0_i32 = arith.constant 0 : i32
    %c0_i32_0 = arith.constant 0 : i32
    return %arg0, %c0_i32 : i32, i32
  }
}

</mosaic_0001>

<bundles_post_ra>
// kernel: model_forward.3
= control target key start
LH: loop header
LB: loop body
LE: loop exit
PB: predicated region body
PF: predicated region fallthrough
CT: control target
= control target key end

     0   :  { %s95_s0 = inlined_call_operand.<no memory space> [shape: f32[1,1], index: 0, kind: input, shape index: {}]   ;;  %s96_s1 = inlined_call_operand.vmem [shape: f32[1,2], index: 1, kind: input, shape index: {}]   ;;  %s97_s2 = inlined_call_operand.hbm [shape: f32[1,2], index: 2, kind: output, shape index: {}]  }
   0x1   :  { %v7_v0 = vstv %s95_s0 }
   0x2   :  { %8 = vst [vmem:[#allocation2] sm:$0x1] %v7_v0 }
   0x3   :  { %v69_v2 = vmov 0  }
   0x4   :  { %46 = vset.pattern.permute.xlu0 %v69_v2 }
   0x9   :  { %v14_v1 = vld [vmem:[#allocation2] sm:$0x1] }
   0xa   :  { %9 = vsyncpa [#allocation4], 0  ;;  %18 = vperm.xlu0 %46, %v14_v1   ;;  %v21_v3 = vlaneseq  ;;  %v15_v6 = vld [vmem:[%s96_s1] sm:$0x1]  ;;  %s70_s13 = smov [#allocation3]   ;;  %vm28_vm0 = vcmask 8192  }
   0xb   :  { %s36_s14 = sshll.u32 %s70_s13, 4  ;;  %s37_s14 = int_to_ptr.vmem [resolvable:$true] %s36_s14 }
   0xc   :  { %v22_v4 = vshrl.u32 %v21_v3, 7  ;;  %s47_s0 = scalar_lea.vmem %s37_s14, 16  ;;  %s51_s15 = scalar_lea.vmem %s37_s14, 32 }
   0xd   :  { %p48_p0 = scmp.ne.s32.totalorder %s37_s14, %s47_s0  ;;  %p52_p1 = scmp.lt.s32.totalorder %s37_s14, %s37_s14 }
   0xe   :  { %v23_v5 = vsub.s32 0, %v22_v4  ;;  %p53_p2 = scmp.lt.s32.totalorder %s51_s15, %s47_s0 }
  0x10   :  { %p54_p3 = por %p53_p2, %p52_p1 }
  0x12   :  { %p55_p4 = pnand %p54_p3, %p48_p0 }
  0x85   :  { %v19_v7 = vpop.permute.xlu0 %18 }
  0x86   :  { %v24_v8 = vrot.slane %v19_v7, %v23_v5 }
  0x88   :  { %v25_v9 = vmul.f32 %v24_v8, %v15_v6 }
  0x8a   :  { %v27_v10 = vmul.f32 %v25_v9, %v25_v9 }
  0x8c   :  { %29 = vst.msk [vmem:[#allocation3] sm:$0x1] %vm28_vm0, %v27_v10 }
  0x8d   :  { %58 = shalt.err (!%p55_p4)
}
  0x8e   :  { %39 = dma.vmem_to_hbm [thread:$0]  %s37_s14, 16, %s97_s2, [#allocation4]  }
  0x8f   :  { %67 = dma.done.wait [#allocation4], 16  }
  0x90   :  { %68 = vsyncadd [#allocation4], 4294967280 }
  0x91   :  { %43 = vsyncpa [#allocation4], 1 }

// kernel: model_forward.2
= control target key start
LH: loop header
LB: loop body
LE: loop exit
PB: predicated region body
PF: predicated region fallthrough
CT: control target
= control target key end

     0   :  { %6 = vsyncpa [#allocation3], 0  ;;  %s107_s0 = inlined_call_operand.hbm [shape: f32[1,2], index: 0, kind: input, shape index: {}]   ;;  %s108_s1 = inlined_call_operand.hbm [shape: f32[1,1], index: 1, kind: output, shape index: {}]  }
   0x1   :  { %7 = vsyncpa [#allocation4], 0  ;;  %s89_s6 = smov [#allocation2]  }
   0x2   :  { %s14_s7 = sshll.u32 %s89_s6, 4  ;;  %s15_s7 = int_to_ptr.vmem [resolvable:$true] %s14_s7 }
   0x3   :  { %s53_s8 = scalar_lea.vmem %s15_s7, 16  ;;  %s57_s9 = scalar_lea.vmem %s15_s7, 32 }
   0x4   :  { %p54_p0 = scmp.ne.s32.totalorder %s15_s7, %s53_s8  ;;  %p58_p1 = scmp.lt.s32.totalorder %s15_s7, %s15_s7 }
   0x5   :  { %p59_p2 = scmp.lt.s32.totalorder %s57_s9, %s53_s8 }
   0x7   :  { %p60_p3 = por %p59_p2, %p58_p1 }
   0x9   :  { %p61_p4 = pnand %p60_p3, %p54_p0 }
   0xb   :  { %64 = shalt.err (!%p61_p4)
}
   0xc   :  { %17 = dma.hbm_to_vmem [thread:$0]  %s107_s0, 16, %s15_s7, [#allocation3]  }
   0xd   :  { %85 = dma.done.wait [#allocation3], 16  }
   0xe   :  { %86 = vsyncadd [#allocation3], 4294967280  ;;  %vm22_vm0 = vcmask 8192   ;;  %v21_v0 = vld [vmem:[#allocation2] sm:$0x1]  ;;  %s90_s12 = smov [#allocation5]  }
   0xf   :  { %v23_v1 = vsel %vm22_vm0, %v21_v0, 0.0  ;;  %s34_s13 = sshll.u32 %s90_s12, 4  ;;  %vm26_vm1 = vcmask 0   ;;  %s35_s13 = int_to_ptr.vmem [resolvable:$true] %s34_s13 }
  0x10   :  { %24 = vadd.xlane.f32.xlu0 %v23_v1  ;;  %s65_s14 = scalar_lea.vmem %s35_s13, 16  ;;  %s69_s15 = scalar_lea.vmem %s35_s13, 32 }
  0x11   :  { %p66_p5 = scmp.ne.s32.totalorder %s35_s13, %s65_s14  ;;  %p70_p6 = scmp.lt.s32.totalorder %s35_s13, %s35_s13 }
  0x12   :  { %p71_p7 = scmp.lt.s32.totalorder %s69_s15, %s65_s14 }
  0x14   :  { %p72_p8 = por %p71_p7, %p70_p6 }
  0x16   :  { %p73_p9 = pnand %p72_p8, %p66_p5 }
  0x99   :  { %v25_v2 = vpop.xlane.xlu0 %24 }
  0x9a   :  { %27 = vst.msk [vmem:[#allocation5] sm:$0x1] %vm26_vm1, %v25_v2 }
  0x9b   :  { %76 = shalt.err (!%p73_p9)
}
  0x9c   :  { %37 = dma.vmem_to_hbm [thread:$0]  %s35_s13, 16, %s108_s1, [#allocation4]  }
  0x9d   :  { %87 = dma.done.wait [#allocation4], 16  }
  0x9e   :  { %88 = vsyncadd [#allocation4], 4294967280 }
  0x9f   :  { %41 = vsyncpa [#allocation3], 1 }
  0xa0   :  { %42 = vsyncpa [#allocation4], 1 }

</bundles_post_ra>
